<compile_context>
chip_gen: v6e
topology: v6e:2x2x1
jax: 0.10.0
libtpu: 0.0.40
codegen_flags: <defaults>
</compile_context>

<pallas_src>
import jax
import jax.numpy as jnp
from jax.experimental import pallas as pl
from jax.experimental.pallas import tpu as pltpu

N_IN = 784        # 1 * 28 * 28
H1 = 128          # fc1 out
H2 = 64           # fc2 out (logical)
H2_PAD = 128      # fc2 out padded to 128 lanes
N_CLASSES = 10    # fc3 out (logical)
N_OUT_PAD = 128   # fc3 out padded to 128 lanes

TB_MAX = 1024     # max batch tile (sublane-aligned, mem-bound sweet spot)


def _mlp_kernel(x_ref, w1_ref, b1_ref, w2_ref, b2_ref, w3_ref, b3_ref, o_ref):
    # x tile arrives f32 (TB, 784); cast to bf16 in-kernel (free under DMA),
    # accumulate / elementwise math in f32.
    x = x_ref[...].astype(jnp.bfloat16)

    # fc1 + ReLU -> (TB, 128)
    h1 = jnp.dot(x, w1_ref[...], preferred_element_type=jnp.float32) + b1_ref[...]
    h1 = jnp.maximum(h1, 0.0)

    # fc2 + ReLU -> (TB, 128) (cols 64:128 exactly zero: zero-padded W2/b2)
    h2 = jnp.dot(h1.astype(jnp.bfloat16), w2_ref[...],
                 preferred_element_type=jnp.float32) + b2_ref[...]
    h2 = jnp.maximum(h2, 0.0)

    # fc3 -> (TB, 128). Padded W3 cols contribute 0 and b3 carries -1e30 in
    # cols 10:128, so padded classes vanish from the softmax normalizer.
    logits = jnp.dot(h2.astype(jnp.bfloat16), w3_ref[...],
                     preferred_element_type=jnp.float32) + b3_ref[...]

    # Numerically stable log_softmax along the class axis (f32, EUP exp/log).
    m = jnp.max(logits, axis=-1, keepdims=True)
    shifted = logits - m
    lse = jnp.log(jnp.sum(jnp.exp(shifted), axis=-1, keepdims=True))
    o_ref[...] = shifted - lse


def _tile_batch(B, tb_max=TB_MAX):
    """Balanced batch tiling: minimal zero-padding, >=2 grid steps when the
    batch is big enough to split (lets v7x shard across both TensorCores)."""
    n_tiles = max(1, pl.cdiv(B, tb_max))
    if B >= 16:
        n_tiles = max(n_tiles, 2)
    tb = ((pl.cdiv(B, n_tiles) + 7) // 8) * 8          # multiple of 8 sublanes
    b_pad = n_tiles * tb
    return tb, b_pad, n_tiles


def prepare_params(params):
    """One-time prep: bf16 MXU weights, f32 biases, lane-padding to 128, and
    the padded-class mask baked into b3. Call once, reuse across forwards."""
    w1, b1, w2, b2, w3, b3 = params
    w1p = w1.astype(jnp.bfloat16)                                               # (784, 128)
    b1p = b1.reshape(1, H1).astype(jnp.float32)                                 # (1, 128)
    w2p = jnp.zeros((H1, H2_PAD), jnp.bfloat16).at[:, :H2].set(w2.astype(jnp.bfloat16))
    b2p = jnp.zeros((1, H2_PAD), jnp.float32).at[:, :H2].set(b2.reshape(1, H2))
    w3p = jnp.zeros((H2_PAD, N_OUT_PAD), jnp.bfloat16).at[:H2, :N_CLASSES].set(w3.astype(jnp.bfloat16))
    # cols 10..127 = -1e30 (finite, not -inf) so they drop out of the softmax.
    b3p = jnp.full((1, N_OUT_PAD), -1e30, jnp.float32).at[:, :N_CLASSES].set(
        b3.reshape(1, N_CLASSES).astype(jnp.float32))
    return (w1p, b1p, w2p, b2p, w3p, b3p)


def fmnist_forward(x, prepared_params, *, tb_max=TB_MAX):
    """x: (B, 1, 28, 28) float32 NCHW. Returns (B, 10) log-probabilities."""
    w1p, b1p, w2p, b2p, w3p, b3p = prepared_params
    B = x.shape[0]
    x_flat = x.reshape(B, -1).astype(jnp.float32)        # (B, 784) == torch .view

    TB, B_pad, n_tiles = _tile_batch(B, tb_max)
    if B_pad != B:
        x_flat = jnp.pad(x_flat, ((0, B_pad - B), (0, 0)))

    out = pl.pallas_call(
        _mlp_kernel,
        out_shape=jax.ShapeDtypeStruct((B_pad, N_OUT_PAD), jnp.float32),
        grid=(n_tiles,),
        in_specs=[
            pl.BlockSpec((TB, N_IN), lambda i: (i, 0)),          # x: tiled over batch (f32)
            pl.BlockSpec((N_IN, H1), lambda i: (0, 0)),          # W1: VMEM-resident
            pl.BlockSpec((1, H1), lambda i: (0, 0)),             # b1
            pl.BlockSpec((H1, H2_PAD), lambda i: (0, 0)),        # W2 (padded)
            pl.BlockSpec((1, H2_PAD), lambda i: (0, 0)),         # b2 (padded)
            pl.BlockSpec((H2_PAD, N_OUT_PAD), lambda i: (0, 0)), # W3 (padded)
            pl.BlockSpec((1, N_OUT_PAD), lambda i: (0, 0)),      # b3 (padded + mask)
        ],
        out_specs=pl.BlockSpec((TB, N_OUT_PAD), lambda i: (i, 0)),
        compiler_params=pltpu.CompilerParams(
            dimension_semantics=("parallel",),
            vmem_limit_bytes=32 * 1024 * 1024,   # v5e default (16 MiB) is too small at TB=1024
        ),
    )(x_flat, w1p, b1p, w2p, b2p, w3p, b3p)

    return out[:B, :N_CLASSES]


def init_params(key):
    """Deterministic init matching nn.Linear shapes, stored as (in, out) / (1, out)."""
    ks = jax.random.split(key, 6)

    def linear(kw, kb, fan_in, fan_out):
        bound = 1.0 / jnp.sqrt(fan_in)
        w = jax.random.uniform(kw, (fan_in, fan_out), jnp.float32, -bound, bound)
        b = jax.random.uniform(kb, (1, fan_out), jnp.float32, -bound, bound)
        return w, b

    w1, b1 = linear(ks[0], ks[1], N_IN, H1)
    w2, b2 = linear(ks[2], ks[3], H1, H2)
    w3, b3 = linear(ks[4], ks[5], H2, N_CLASSES)
    return (w1, b1, w2, b2, w3, b3)


def reference_forward(x, params):
    """Pure-JAX reference applying the same bf16-matmul / f32-accumulate policy."""
    w1, b1, w2, b2, w3, b3 = params
    xf = x.reshape(x.shape[0], -1).astype(jnp.bfloat16)
    h1 = jnp.maximum(jnp.dot(xf, w1.astype(jnp.bfloat16),
                             preferred_element_type=jnp.float32) + b1, 0.0)
    h2 = jnp.maximum(jnp.dot(h1.astype(jnp.bfloat16), w2.astype(jnp.bfloat16),
                             preferred_element_type=jnp.float32) + b2, 0.0)
    logits = jnp.dot(h2.astype(jnp.bfloat16), w3.astype(jnp.bfloat16),
                     preferred_element_type=jnp.float32) + b3
    return jax.nn.log_softmax(logits, axis=-1)


if __name__ == "__main__":
    key = jax.random.PRNGKey(0)
    k_params, k_x1, k_x2 = jax.random.split(key, 3)

    params = init_params(k_params)
    prepared = jax.tree_util.tree_map(lambda a: a, prepare_params(params))  # one-time prep

    fwd = jax.jit(fmnist_forward)

    # Case 1: tiny batch (single grid step).
    x = jax.random.normal(k_x1, (8, 1, 28, 28), dtype=jnp.float32)
    out = jax.block_until_ready(fwd(x, prepared))
    assert out.shape == (8, N_CLASSES)
    row_sums = jnp.exp(out).sum(axis=-1)
    assert bool(jnp.all(jnp.abs(row_sums - 1.0) < 1e-3))
    ref = reference_forward(x, params)
    assert bool(jnp.all(jnp.abs(out - ref) < 2e-3)), float(jnp.max(jnp.abs(out - ref)))

    # Case 2: batch that exercises multi-tile grid (>=2 steps) + batch padding.
    x2 = jax.random.normal(k_x2, (20, 1, 28, 28), dtype=jnp.float32)
    out2 = jax.block_until_ready(fwd(x2, prepared))
    assert out2.shape == (20, N_CLASSES)
    row_sums2 = jnp.exp(out2).sum(axis=-1)
    assert bool(jnp.all(jnp.abs(row_sums2 - 1.0) < 1e-3))
    ref2 = reference_forward(x2, params)
    assert bool(jnp.all(jnp.abs(out2 - ref2) < 2e-3)), float(jnp.max(jnp.abs(out2 - ref2)))

    print("KERNEL_OK")
</pallas_src>

<mosaic_0001>
module attributes {stable_mosaic.version = 11 : i64} {
  func.func @_mlp_kernel(%arg0: i32, %arg1: memref<8x784xf32, #tpu.memory_space<vmem>>, %arg2: memref<784x128xbf16, #tpu.memory_space<vmem>>, %arg3: memref<1x128xf32, #tpu.memory_space<vmem>>, %arg4: memref<128x128xbf16, #tpu.memory_space<vmem>>, %arg5: memref<1x128xf32, #tpu.memory_space<vmem>>, %arg6: memref<128x128xbf16, #tpu.memory_space<vmem>>, %arg7: memref<1x128xf32, #tpu.memory_space<vmem>>, %arg8: memref<8x128xf32, #tpu.memory_space<vmem>>) attributes {dimension_semantics = [#tpu.dimension_semantics<parallel>], iteration_bounds = array<i64: 1>, scalar_prefetch = 0 : i64, scratch_operands = 0 : i64, tpu.core_type = #tpu.core_type<tc>, window_params = [{transform_indices = @transform_0, window_bounds = array<i64: 8, 784>}, {pipeline_mode = #tpu.pipeline_mode<synchronous>, transform_indices = @transform_1, window_bounds = array<i64: 784, 128>}, {pipeline_mode = #tpu.pipeline_mode<synchronous>, transform_indices = @transform_2, window_bounds = array<i64: 1, 128>}, {pipeline_mode = #tpu.pipeline_mode<synchronous>, transform_indices = @transform_3, window_bounds = array<i64: 128, 128>}, {pipeline_mode = #tpu.pipeline_mode<synchronous>, transform_indices = @transform_4, window_bounds = array<i64: 1, 128>}, {pipeline_mode = #tpu.pipeline_mode<synchronous>, transform_indices = @transform_5, window_bounds = array<i64: 128, 128>}, {pipeline_mode = #tpu.pipeline_mode<synchronous>, transform_indices = @transform_6, window_bounds = array<i64: 1, 128>}, {transform_indices = @transform_7, window_bounds = array<i64: 8, 128>}]} {
    %c0 = arith.constant 0 : index
    %c0_0 = arith.constant 0 : index
    %0 = vector.load %arg1[%c0, %c0_0] : memref<8x784xf32, #tpu.memory_space<vmem>>, vector<8x784xf32>
    %1 = arith.truncf %0 : vector<8x784xf32> to vector<8x784xbf16>
    %c0_1 = arith.constant 0 : index
    %c0_2 = arith.constant 0 : index
    %2 = vector.load %arg2[%c0_1, %c0_2] : memref<784x128xbf16, #tpu.memory_space<vmem>>, vector<784x128xbf16>
    %cst = arith.constant dense<0.000000e+00> : vector<8x128xf32>
    %3 = tpu.matmul %1, %2, %cst {dimension_numbers = #tpu.dot_dimension_numbers<[1], [0], [0], [1], [0, 0, 1, 1], [], []>} : vector<8x784xbf16>, vector<784x128xbf16>, vector<8x128xf32> -> vector<8x128xf32>
    %c0_3 = arith.constant 0 : index
    %c0_4 = arith.constant 0 : index
    %4 = vector.load %arg3[%c0_3, %c0_4] : memref<1x128xf32, #tpu.memory_space<vmem>>, vector<1x128xf32>
    %5 = vector.broadcast %4 : vector<1x128xf32> to vector<8x128xf32>
    %6 = arith.addf %3, %5 : vector<8x128xf32>
    %cst_5 = arith.constant 0.000000e+00 : f32
    %7 = vector.broadcast %cst_5 : f32 to vector<8x128xf32>
    %8 = arith.maximumf %6, %7 : vector<8x128xf32>
    %9 = arith.truncf %8 : vector<8x128xf32> to vector<8x128xbf16>
    %c0_6 = arith.constant 0 : index
    %c0_7 = arith.constant 0 : index
    %10 = vector.load %arg4[%c0_6, %c0_7] : memref<128x128xbf16, #tpu.memory_space<vmem>>, vector<128x128xbf16>
    %cst_8 = arith.constant dense<0.000000e+00> : vector<8x128xf32>
    %11 = tpu.matmul %9, %10, %cst_8 {dimension_numbers = #tpu.dot_dimension_numbers<[1], [0], [0], [1], [0, 0, 1, 1], [], []>} : vector<8x128xbf16>, vector<128x128xbf16>, vector<8x128xf32> -> vector<8x128xf32>
    %c0_9 = arith.constant 0 : index
    %c0_10 = arith.constant 0 : index
    %12 = vector.load %arg5[%c0_9, %c0_10] : memref<1x128xf32, #tpu.memory_space<vmem>>, vector<1x128xf32>
    %13 = vector.broadcast %12 : vector<1x128xf32> to vector<8x128xf32>
    %14 = arith.addf %11, %13 : vector<8x128xf32>
    %cst_11 = arith.constant 0.000000e+00 : f32
    %15 = vector.broadcast %cst_11 : f32 to vector<8x128xf32>
    %16 = arith.maximumf %14, %15 : vector<8x128xf32>
    %17 = arith.truncf %16 : vector<8x128xf32> to vector<8x128xbf16>
    %c0_12 = arith.constant 0 : index
    %c0_13 = arith.constant 0 : index
    %18 = vector.load %arg6[%c0_12, %c0_13] : memref<128x128xbf16, #tpu.memory_space<vmem>>, vector<128x128xbf16>
    %cst_14 = arith.constant dense<0.000000e+00> : vector<8x128xf32>
    %19 = tpu.matmul %17, %18, %cst_14 {dimension_numbers = #tpu.dot_dimension_numbers<[1], [0], [0], [1], [0, 0, 1, 1], [], []>} : vector<8x128xbf16>, vector<128x128xbf16>, vector<8x128xf32> -> vector<8x128xf32>
    %c0_15 = arith.constant 0 : index
    %c0_16 = arith.constant 0 : index
    %20 = vector.load %arg7[%c0_15, %c0_16] : memref<1x128xf32, #tpu.memory_space<vmem>>, vector<1x128xf32>
    %21 = vector.broadcast %20 : vector<1x128xf32> to vector<8x128xf32>
    %22 = arith.addf %19, %21 : vector<8x128xf32>
    %cst_17 = arith.constant dense<0xFF800000> : vector<8xf32>
    %23 = vector.multi_reduction <maximumf>, %22, %cst_17 [1] : vector<8x128xf32> to vector<8xf32>
    %24 = vector.shape_cast %23 : vector<8xf32> to vector<8x1xf32>
    %25 = vector.broadcast %24 : vector<8x1xf32> to vector<8x128xf32>
    %26 = arith.subf %22, %25 : vector<8x128xf32>
    %27 = math.exp %26 : vector<8x128xf32>
    %cst_18 = arith.constant dense<0.000000e+00> : vector<8xf32>
    %28 = vector.multi_reduction <add>, %27, %cst_18 [1] : vector<8x128xf32> to vector<8xf32>
    %29 = vector.shape_cast %28 : vector<8xf32> to vector<8x1xf32>
    %30 = math.log %29 : vector<8x1xf32>
    %31 = vector.broadcast %30 : vector<8x1xf32> to vector<8x128xf32>
    %32 = arith.subf %26, %31 : vector<8x128xf32>
    %c0_19 = arith.constant 0 : index
    %c0_20 = arith.constant 0 : index
    %33 = vector.load %arg8[%c0_19, %c0_20] : memref<8x128xf32, #tpu.memory_space<vmem>>, vector<8x128xf32>
    tpu.vector_store %arg8[%c0_19, %c0_20], %32 {strides = array<i32>} : memref<8x128xf32, #tpu.memory_space<vmem>>, vector<8x128xf32>,
    return
  }
  func.func @transform_0(%arg0: i32) -> (i32, i32) {
    %c0_i32 = arith.constant 0 : i32
    %c0_i32_0 = arith.constant 0 : i32
    return %arg0, %c0_i32 : i32, i32
  }
  func.func @transform_1(%arg0: i32) -> (i32, i32) {
    %c0_i32 = arith.constant 0 : i32
    %c0_i32_0 = arith.constant 0 : i32
    %c0_i32_1 = arith.constant 0 : i32
    return %c0_i32, %c0_i32_0 : i32, i32
  }
  func.func @transform_2(%arg0: i32) -> (i32, i32) {
    %c0_i32 = arith.constant 0 : i32
    %c0_i32_0 = arith.constant 0 : i32
    %c0_i32_1 = arith.constant 0 : i32
    return %c0_i32, %c0_i32_0 : i32, i32
  }
  func.func @transform_3(%arg0: i32) -> (i32, i32) {
    %c0_i32 = arith.constant 0 : i32
    %c0_i32_0 = arith.constant 0 : i32
    %c0_i32_1 = arith.constant 0 : i32
    return %c0_i32, %c0_i32_0 : i32, i32
  }
  func.func @transform_4(%arg0: i32) -> (i32, i32) {
    %c0_i32 = arith.constant 0 : i32
    %c0_i32_0 = arith.constant 0 : i32
    %c0_i32_1 = arith.constant 0 : i32
    return %c0_i32, %c0_i32_0 : i32, i32
  }
  func.func @transform_5(%arg0: i32) -> (i32, i32) {
    %c0_i32 = arith.constant 0 : i32
    %c0_i32_0 = arith.constant 0 : i32
    %c0_i32_1 = arith.constant 0 : i32
    return %c0_i32, %c0_i32_0 : i32, i32
  }
  func.func @transform_6(%arg0: i32) -> (i32, i32) {
    %c0_i32 = arith.constant 0 : i32
    %c0_i32_0 = arith.constant 0 : i32
    %c0_i32_1 = arith.constant 0 : i32
    return %c0_i32, %c0_i32_0 : i32, i32
  }
  func.func @transform_7(%arg0: i32) -> (i32, i32) {
    %c0_i32 = arith.constant 0 : i32
    %c0_i32_0 = arith.constant 0 : i32
    return %arg0, %c0_i32 : i32, i32
  }
}

</mosaic_0001>

<bundles_post_ra>
// kernel: fmnist_forward.1
= control target key start
LH: loop header
LB: loop body
LE: loop exit
PB: predicated region body
PF: predicated region fallthrough
CT: control target
= control target key end

     0   :  { %v1151_v44 = vmov 0.0   ;;  %vm1152_vm0 = vmmov 0   ;;  %vm441_vm1 = vcmask 130048   ;;  %s1445_s0 = inlined_call_operand.vmem [shape: f32[8,784], index: 0, kind: input, shape index: {}]   ;;  %s1446_s1 = inlined_call_operand.vmem [shape: bf16[784,128], index: 1, kind: input, shape index: {}]   ;;  %s1447_s2 = inlined_call_operand.vmem [shape: f32[1,128], index: 2, kind: input, shape index: {}]   ;;  %s1448_s3 = inlined_call_operand.vmem [shape: bf16[128,128], index: 3, kind: input, shape index: {}]   ;;  %s1449_s4 = inlined_call_operand.vmem [shape: f32[1,128], index: 4, kind: input, shape index: {}]   ;;  %s1450_s5 = inlined_call_operand.vmem [shape: bf16[128,128], index: 5, kind: input, shape index: {}]   ;;  %s1451_s6 = inlined_call_operand.vmem [shape: f32[1,128], index: 6, kind: input, shape index: {}]   ;;  %s1452_s7 = inlined_call_operand.hbm [shape: f32[8,128], index: 7, kind: output, shape index: {}]  }
   0x1   :  { %v1060_v0 = vld [vmem:[%s1446_s1 + $0x78] sm:$0xff]   ;;  %v1064_v4 = vld [vmem:[%s1446_s1 + $0x70] sm:$0xff]   ;;  %v1068_v8 = vld [vmem:[%s1446_s1 + $0x68] sm:$0xff]  }
   0x2   :  { %v1061_v1 = vld [vmem:[%s1446_s1 + $0x38] sm:$0xff]   ;;  %925 = vmatprep.subr.bf16.mxu0 %v1060_v0  ;;  %v1065_v5 = vld [vmem:[%s1446_s1 + $0x30] sm:$0xff]   ;;  %v1069_v9 = vld [vmem:[%s1446_s1 + $0x28] sm:$0xff]  }
   0x3   :  { %v1062_v2 = vld [vmem:[%s1446_s1 + $0xf8] sm:$0xff]   ;;  %926 = vmatpush3.bf16.msra.mxu0 %v1061_v1  ;;  %v1066_v6 = vld [vmem:[%s1446_s1 + $0xf0] sm:$0xff]   ;;  %v1070_v10 = vld [vmem:[%s1446_s1 + $0xe8] sm:$0xff]  }
   0x4   :  { %v1063_v3 = vld [vmem:[%s1446_s1 + $0xb8] sm:$0xff]   ;;  %947 = vmatprep.subr.bf16.mxu1 %v1062_v2  ;;  %927 = vmatprep.subr.bf16.mxu0 %v1064_v4  ;;  %v1067_v7 = vld [vmem:[%s1446_s1 + $0xb0] sm:$0xff]   ;;  %v1071_v11 = vld [vmem:[%s1446_s1 + $0xa8] sm:$0xff]  }
   0x5   :  { %948 = vmatpush3.bf16.msra.mxu1 %v1063_v3  ;;  %v1072_v12 = vld [vmem:[%s1446_s1 + $0x60] sm:$0xff]   ;;  %v1076_v16 = vld [vmem:[%s1446_s1 + $0x58] sm:$0xff]   ;;  %v1080_v20 = vld [vmem:[%s1446_s1 + $0x50] sm:$0xff]  }
   0x6   :  { %949 = vmatprep.subr.bf16.mxu1 %v1066_v6  ;;  %v1073_v13 = vld [vmem:[%s1446_s1 + $0x20] sm:$0xff]   ;;  %v1077_v17 = vld [vmem:[%s1446_s1 + $0x18] sm:$0xff]   ;;  %v1081_v21 = vld [vmem:[%s1446_s1 + $0x10] sm:$0xff]  }
   0x7   :  { %928 = vmatpush3.bf16.msra.mxu0 %v1065_v5  ;;  %v1074_v14 = vld [vmem:[%s1446_s1 + $0xe0] sm:$0xff]   ;;  %v1078_v18 = vld [vmem:[%s1446_s1 + $0xd8] sm:$0xff]   ;;  %v1082_v22 = vld [vmem:[%s1446_s1 + $0xd0] sm:$0xff]  }
   0x8   :  { %929 = vmatprep.subr.bf16.mxu0 %v1068_v8  ;;  %v1075_v15 = vld [vmem:[%s1446_s1 + $0xa0] sm:$0xff]   ;;  %v1079_v19 = vld [vmem:[%s1446_s1 + $0x98] sm:$0xff]   ;;  %v1083_v23 = vld [vmem:[%s1446_s1 + $0x90] sm:$0xff]  }
   0x9   :  { %950 = vmatpush3.bf16.msra.mxu1 %v1067_v7  ;;  %v1084_v24 = vld [vmem:[%s1446_s1 + $0x48] sm:$0xff]   ;;  %v1088_v28 = vld [vmem:[%s1446_s1 + $0x40] sm:$0xff]   ;;  %v1092_v36 = vld [vmem:[%s1446_s1 + $0x178] sm:$0xff]  }
   0xa   :  { %951 = vmatprep.subr.bf16.mxu1 %v1070_v10  ;;  %v1085_v25 = vld [vmem:[%s1446_s1 + $0x8] sm:$0xff]   ;;  %v1089_v29 = vld [vmem:[%s1446_s1] sm:$0xff]   ;;  %v31_v37 = vld [vmem:[%s1445_s0 + $0x18] sm:$0xff] }
   0xb   :  { %930 = vmatpush3.bf16.msra.mxu0 %v1069_v9  ;;  %v1086_v26 = vld [vmem:[%s1446_s1 + $0xc8] sm:$0xff]   ;;  %v1090_v30 = vld [vmem:[%s1446_s1 + $0xc0] sm:$0xff]   ;;  %v38_v38 = vpack.c.bf16 %v31_v37, %v31_v37  ;;  %v1093_v39 = vld [vmem:[%s1446_s1 + $0x138] sm:$0xff]  }
   0xc   :  { %931 = vmatprep.subr.bf16.mxu0 %v1072_v12  ;;  %v1087_v27 = vld [vmem:[%s1446_s1 + $0x88] sm:$0xff]   ;;  %v1091_v33 = vld [vmem:[%s1446_s1 + $0x80] sm:$0xff]   ;;  %v30_v40 = vld [vmem:[%s1445_s0 + $0x10] sm:$0xff] }
   0xd   :  { %952 = vmatpush3.bf16.msra.mxu1 %v1071_v11  ;;  %v29_v31 = vld [vmem:[%s1445_s0 + $0x8] sm:$0xff]  ;;  %v28_v34 = vld [vmem:[%s1445_s0] sm:$0xff]  ;;  %517 = vmatprep.mubr.bf16.mxu1 %v38_v38  ;;  %v37_v41 = vpack.c.bf16 %v30_v40, %v30_v40  ;;  %v1094_v42 = vld [vmem:[%s1446_s1 + $0x170] sm:$0xff]  }
   0xe   :  { %953 = vmatprep.subr.bf16.mxu1 %v1074_v14  ;;  %v36_v32 = vpack.c.bf16 %v29_v31, %v29_v31  ;;  %v35_v35 = vpack.c.bf16 %v28_v34, %v28_v34  ;;  %v1095_v43 = vld [vmem:[%s1446_s1 + $0x130] sm:$0xff]   ;;  %v1096_v45 = vld [vmem:[%s1446_s1 + $0x168] sm:$0xff]   ;;  %v1098_v47 = vld [vmem:[%s1446_s1 + $0x160] sm:$0xff]  }
   0xf   :  { %932 = vmatpush3.bf16.msra.mxu0 %v1073_v13  ;;  %v1097_v46 = vld [vmem:[%s1446_s1 + $0x128] sm:$0xff]   ;;  %v1099_v48 = vld [vmem:[%s1446_s1 + $0x120] sm:$0xff]   ;;  %v1100_v49 = vld [vmem:[%s1446_s1 + $0x158] sm:$0xff]  }
  0x10   :  { %933 = vmatprep.subr.bf16.mxu0 %v1076_v16  ;;  %477 = vmatprep.mubr.bf16.mxu0 %v36_v32  ;;  %v1101_v50 = vld [vmem:[%s1446_s1 + $0x118] sm:$0xff]   ;;  %v1102_v51 = vld [vmem:[%s1446_s1 + $0x150] sm:$0xff]   ;;  %v1108_v53 = vld [vmem:[%s1446_s1 + $0x180] sm:$0xff]  }
  0x11   :  { %954 = vmatpush3.bf16.msra.mxu1 %v1075_v15  ;;  %v1103_v52 = vld [vmem:[%s1446_s1 + $0x110] sm:$0xff]   ;;  %v33_v54 = vld [vmem:[%s1445_s0 + $0x28] sm:$0xff]  ;;  %v1106_v60 = vld [vmem:[%s1446_s1 + $0x140] sm:$0xff]  }
  0x12   :  { %955 = vmatprep.subr.bf16.mxu1 %v1078_v18  ;;  %v1104_v55 = vld [vmem:[%s1446_s1 + $0x148] sm:$0xff]   ;;  %v40_v56 = vpack.c.bf16 %v33_v54, %v33_v54  ;;  %v34_v57 = vld [vmem:[%s1445_s0 + $0x30] sm:$0xff]  ;;  %v1107_v61 = vld [vmem:[%s1446_s1 + $0x100] sm:$0xff]  }
  0x13   :  { %934 = vmatpush3.bf16.msra.mxu0 %v1077_v17  ;;  %v41_v58 = vpack.c.bf16 %v34_v57, %v34_v57  ;;  %v1105_v59 = vld [vmem:[%s1446_s1 + $0x108] sm:$0xff]   ;;  %v32_v62 = vld [vmem:[%s1445_s0 + $0x20] sm:$0xff] }
  0x14   :  { %935 = vmatprep.subr.bf16.mxu0 %v1080_v20 }
  0x15   :  { %956 = vmatpush3.bf16.msra.mxu1 %v1079_v19 }
  0x16   :  { %957 = vmatprep.subr.bf16.mxu1 %v1082_v22 }
  0x17   :  { %936 = vmatpush3.bf16.msra.mxu0 %v1081_v21 }
  0x18   :  { %937 = vmatprep.subr.bf16.mxu0 %v1084_v24 }
  0x19   :  { %958 = vmatpush3.bf16.msra.mxu1 %v1083_v23 }
  0x1a   :  { %959 = vmatprep.subr.bf16.mxu1 %v1086_v26 }
  0x1b   :  { %938 = vmatpush3.bf16.msra.mxu0 %v1085_v25 }
  0x1c   :  { %939 = vmatprep.subr.bf16.mxu0 %v1088_v28 }
  0x1d   :  { %960 = vmatpush3.bf16.msra.mxu1 %v1087_v27 }
  0x1e   :  { %961 = vmatprep.subr.bf16.mxu1 %v1090_v30 }
  0x1f   :  { %940 = vmatpush3.bf16.msra.mxu0 %v1089_v29 }
  0x20   :  { %969 = vmatprep.subr.bf16.mxu0 %v1092_v36 }
  0x21   :  { %962 = vmatpush3.bf16.msra.mxu1 %v1091_v33 }
  0x22   :  { %478 = vmatmul.mubr.bf16.vlgmr.msra.gmra.mxu0 %v35_v35  ;;  %1011 = vmatprep.subr.bf16.mxu1 %v1151_v44 }
  0x23   :  { %970 = vmatpush3.bf16.msra.mxu0 %v1093_v39  ;;  %557 = vmatprep.mubr.bf16.mxu0 %v40_v56 }
  0x24   :  { %518 = vmatmul.mubr.bf16.vlgmr.msra.gmra.mxu1 %v37_v41  ;;  %971 = vmatprep.subr.bf16.mxu0 %v1094_v42 }
  0x25   :  { %1013 = vmatprep.mubr.msk.bf16.mxu1 %vm1152_vm0, %v1151_v44  ;;  %1012 = vmatpush3.bf16.msra.mxu1 %v1108_v53 }
  0x26   :  { %1017 = vmatprep.subr.bf16.mxu1 %v1151_v44 }
  0x27   :  { %972 = vmatpush3.bf16.msra.mxu0 %v1095_v43 }
  0x28   :  { %973 = vmatprep.subr.bf16.mxu0 %v1096_v45 }
  0x2b   :  { %974 = vmatpush3.bf16.msra.mxu0 %v1097_v46 }
  0x2c   :  { %975 = vmatprep.subr.bf16.mxu0 %v1098_v47  ;;  %1014 = vmatmul.mubr.msk.bf16.vlgmr.msra.gmra.mxu1 %vm441_vm1, %v41_v58 }
  0x2d   :  { %1033 = vmatprep.mubr.msk.bf16.mxu1 %vm1152_vm0, %v1151_v44 }
  0x2f   :  { %976 = vmatpush3.bf16.msra.mxu0 %v1099_v48 }
  0x30   :  { %977 = vmatprep.subr.bf16.mxu0 %v1100_v49 }
  0x33   :  { %978 = vmatpush3.bf16.msra.mxu0 %v1101_v50 }
  0x34   :  { %979 = vmatprep.subr.bf16.mxu0 %v1102_v51 }
  0x37   :  { %980 = vmatpush3.bf16.msra.mxu0 %v1103_v52 }
  0x38   :  { %981 = vmatprep.subr.bf16.mxu0 %v1104_v55 }
  0x3b   :  { %982 = vmatpush3.bf16.msra.mxu0 %v1105_v59 }
  0x3c   :  { %983 = vmatprep.subr.bf16.mxu0 %v1106_v60 }
  0x3d   :  { %12 = vsyncpa [#allocation3], 0  ;;  %v39_v63 = vpack.c.bf16 %v32_v62, %v32_v62  ;;  %v1109_v0 = vld [vmem:[%s1448_s3 + $0x38] sm:$0xff]   ;;  %v1110_v1 = vld [vmem:[%s1448_s3 + $0x30] sm:$0xff]  }
  0x3e   :  { %1018 = vmatpush3.bf16.msra.mxu1 %v1109_v0  ;;  %v1111_v2 = vld [vmem:[%s1448_s3 + $0x28] sm:$0xff]   ;;  %v1112_v3 = vld [vmem:[%s1448_s3 + $0x20] sm:$0xff]   ;;  %v1113_v4 = vld [vmem:[%s1448_s3 + $0x18] sm:$0xff]  }
  0x3f   :  { %984 = vmatpush3.bf16.msra.mxu0 %v1107_v61  ;;  %1019 = vmatprep.subr.bf16.mxu1 %v1151_v44  ;;  %v1114_v5 = vld [vmem:[%s1448_s3 + $0x10] sm:$0xff]   ;;  %v1115_v6 = vld [vmem:[%s1448_s3 + $0x8] sm:$0xff]   ;;  %v1116_v7 = vld [vmem:[%s1448_s3] sm:$0xff]  }
  0x40   :  { %1037 = vmatprep.subr.bf16.mxu0 %v1151_v44  ;;  %v1117_v8 = vld [vmem:[%s1450_s5 + $0x38] sm:$0xff]   ;;  %v1118_v9 = vld [vmem:[%s1450_s5 + $0x30] sm:$0xff]   ;;  %v1119_v10 = vld [vmem:[%s1450_s5 + $0x28] sm:$0xff]  }
  0x41   :  { %v1120_v11 = vld [vmem:[%s1450_s5 + $0x20] sm:$0xff]   ;;  %v1121_v12 = vld [vmem:[%s1450_s5 + $0x18] sm:$0xff]   ;;  %v1122_v13 = vld [vmem:[%s1450_s5 + $0x10] sm:$0xff]  }
  0x42   :  { %558 = vmatmul.mubr.bf16.vlgmr.msra.gmra.mxu0 %v39_v63  ;;  %1020 = vmatpush3.bf16.msra.mxu1 %v1110_v1  ;;  %v856_v27 = vld [vmem:[%s1447_s2] ss:$0 sm:$0xff]  ;;  %v1123_v40 = vld [vmem:[%s1450_s5 + $0x8] sm:$0xff]  }
  0x43   :  { %1053 = vmatprep.mubr.msk.bf16.mxu0 %vm1152_vm0, %v1151_v44  ;;  %1021 = vmatprep.subr.bf16.mxu1 %v1151_v44  ;;  %v1124_v41 = vld [vmem:[%s1450_s5] sm:$0xff]  }
  0x44   :  { %1038 = vmatpush3.bf16.msra.mxu0 %v1117_v8  ;;  %v907_v42 = vld [vmem:[%s1449_s4] ss:$0 sm:$0xff]  ;;  %s1153_s4 = smov [#allocation2]  }
  0x45   :  { %1039 = vmatprep.subr.bf16.mxu0 %v1151_v44  ;;  %s848_s5 = sshll.u32 %s1153_s4, 4  ;;  %s849_s5 = int_to_ptr.vmem [resolvable:$true] %s848_s5 }
  0x46   :  { %1022 = vmatpush3.bf16.msra.mxu1 %v1111_v2  ;;  %p1134_p1 = scmp.lt.s32.totalorder %s849_s5, %s849_s5 }
  0x47   :  { %1023 = vmatprep.subr.bf16.mxu1 %v1151_v44 }
  0x48   :  { %1040 = vmatpush3.bf16.msra.mxu0 %v1118_v9 }
  0x49   :  { %1041 = vmatprep.subr.bf16.mxu0 %v1151_v44 }
  0x4a   :  { %1024 = vmatpush3.bf16.msra.mxu1 %v1112_v3 }
  0x4b   :  { %1025 = vmatprep.subr.bf16.mxu1 %v1151_v44 }
  0x4c   :  { %1042 = vmatpush3.bf16.msra.mxu0 %v1119_v10 }
  0x4d   :  { %1043 = vmatprep.subr.bf16.mxu0 %v1151_v44 }
  0x4e   :  { %1026 = vmatpush3.bf16.msra.mxu1 %v1113_v4 }
  0x4f   :  { %1027 = vmatprep.subr.bf16.mxu1 %v1151_v44 }
  0x50   :  { %1044 = vmatpush3.bf16.msra.mxu0 %v1120_v11 }
  0x51   :  { %1045 = vmatprep.subr.bf16.mxu0 %v1151_v44 }
  0x52   :  { %1028 = vmatpush3.bf16.msra.mxu1 %v1114_v5 }
  0x53   :  { %1029 = vmatprep.subr.bf16.mxu1 %v1151_v44 }
  0x54   :  { %1046 = vmatpush3.bf16.msra.mxu0 %v1121_v12 }
  0x55   :  { %1047 = vmatprep.subr.bf16.mxu0 %v1151_v44 }
  0x56   :  { %1030 = vmatpush3.bf16.msra.mxu1 %v1115_v6 }
  0x57   :  { %1031 = vmatprep.subr.bf16.mxu1 %v1151_v44 }
  0x58   :  { %1048 = vmatpush3.bf16.msra.mxu0 %v1122_v13 }
  0x59   :  { %1049 = vmatprep.subr.bf16.mxu0 %v1151_v44 }
  0x5a   :  { %1032 = vmatpush3.bf16.msra.mxu1 %v1116_v7 }
  0x5c   :  { %1050 = vmatpush3.bf16.msra.mxu0 %v1123_v40 }
  0x5d   :  { %1051 = vmatprep.subr.bf16.mxu0 %v1151_v44  ;;  %v916_v44 = vld [vmem:[%s1451_s6] ss:$0 sm:$0xff]  ;;  %s1129_s6 = scalar_lea.vmem %s849_s5, 128 }
  0x5e   :  { %p1130_p0 = scmp.ne.s32.totalorder %s849_s5, %s1129_s6  ;;  %p1135_p2 = scmp.lt.s32.totalorder %s1129_s6, %s1129_s6 }
  0x60   :  { %1052 = vmatpush3.bf16.msra.mxu0 %v1124_v41  ;;  %p1136_p3 = por %p1135_p2, %p1134_p1 }
  0x62   :  { %p1137_p4 = pnand %p1136_p3, %p1130_p0 }
  0xe2   :  { %v941_v14 = vpop.f32.mrf.mxu0 }
  0xe4   :  { %v942_v15 = vpop.f32.mrf.mxu0  ;;  %v963_v16 = vpop.f32.mrf.mxu1 }
  0xe5   :  { %v943_v26 = vadd.f32 %v942_v15, %v941_v14 }
  0xe6   :  { %v944_v17 = vpop.f32.mrf.mxu0  ;;  %v964_v18 = vpop.f32.mrf.mxu1 }
  0xe7   :  { %v480_v28 = vadd.f32 %v943_v26, %v856_v27  ;;  %v965_v29 = vadd.f32 %v964_v18, %v963_v16 }
  0xe8   :  { %v945_v19 = vpop.f32.mrf.mxu0  ;;  %v966_v20 = vpop.f32.mrf.mxu1 }
  0xe9   :  { %v520_v32 = vadd.f32 %v965_v29, %v480_v28 }
  0xea   :  { %v967_v21 = vpop.f32.mrf.mxu1 }
  0xec   :  { %v599_v22 = vpop.f32.mrf.mxu1 }
  0xee   :  { %v1015_v23 = vpop.f32.mrf.mxu1 }
  0xf0   :  { %v602_v24 = vpop.f32.mrf.mxu1 }
  0xf2   :  { %v1016_v25 = vpop.f32.mrf.mxu1 }
 0x102   :  { %v985_v30 = vpop.f32.mrf.mxu0 }
 0x104   :  { %v986_v31 = vpop.f32.mrf.mxu0 }
 0x105   :  { %v987_v33 = vadd.f32 %v986_v31, %v985_v30 }
 0x106   :  { %v988_v34 = vpop.f32.mrf.mxu0 }
 0x107   :  { %v560_v35 = vadd.f32 %v987_v33, %v520_v32 }
 0x108   :  { %v989_v36 = vpop.f32.mrf.mxu0 }
 0x109   :  { %v600_v37 = vadd.f32 %v599_v22, %v560_v35 }
 0x10b   :  { %v605_v38 = vmax.f32 %v600_v37, 0.0 }
 0x10d   :  { %v606_v39 = vpack.c.bf16 %v605_v38, %v605_v38 }
 0x10f   :  { %1034 = vmatmul.mubr.bf16.vlgmr.msra.gmra.mxu1 %v606_v39 }
 0x1cf   :  { %v712_v43 = vpop.f32.mrf.mxu1 }
 0x1d0   :  { %v713_v45 = vadd.f32 %v907_v42, %v712_v43 }
 0x1d1   :  { %v1035_v46 = vpop.f32.mrf.mxu1 }
 0x1d2   :  { %v718_v47 = vmax.f32 %v713_v45, 0.0 }
 0x1d3   :  { %v715_v48 = vpop.f32.mrf.mxu1 }
 0x1d4   :  { %v719_v49 = vpack.c.bf16 %v718_v47, %v718_v47 }
 0x1d5   :  { %v1036_v50 = vpop.f32.mrf.mxu1 }
 0x1d6   :  { %1054 = vmatmul.mubr.bf16.vlgmr.msra.gmra.mxu0 %v719_v49 }
 0x296   :  { %v825_v51 = vpop.f32.mrf.mxu0 }
 0x297   :  { %v826_v52 = vadd.f32 %v916_v44, %v825_v51 }
 0x298   :  { %v1055_v53 = vpop.f32.mrf.mxu0 }
 0x299   :  { %831 = vmax.xlane.f32.xlu0 %v826_v52 }
 0x29a   :  { %v828_v54 = vpop.f32.mrf.mxu0 }
 0x29c   :  { %v1056_v55 = vpop.f32.mrf.mxu0 }
 0x322   :  { %v832_v56 = vpop.xlane.xlu0 %831 }
 0x323   :  { %v833_v57 = vsub.f32 %v826_v52, %v832_v56 }
 0x325   :  { %v834_v58 = vmul.f32 1.442695, %v833_v57 }
 0x327   :  { %1125 = vpow2.f32 %v834_v58 }
 0x334   :  { %v1126_v59 = vpop.eup %1125 }
 0x335   :  { %836 = vadd.xlane.f32.xlu0 %v1126_v59 }
 0x3be   :  { %v837_v60 = vpop.xlane.xlu0 %836 }
 0x3bf   :  { %1127 = vlog2.f32 %v837_v60 }
 0x3cc   :  { %v1128_v61 = vpop.eup %1127 }
 0x3cd   :  { %v839_v62 = vmul.f32 0.6931472, %v1128_v61 }
 0x3cf   :  { %v840_v63 = vsub.f32 %v833_v57, %v839_v62 }
 0x3d1   :  { %841 = vst [vmem:[#allocation2] sm:$0xff] %v840_v63 }
 0x3d2   :  { %1140 = shalt.err (!%p1137_p4)
}
 0x3d3   :  { %851 = dma.vmem_to_hbm [thread:$0]  %s849_s5, 128, %s1452_s7, [#allocation3]  }
 0x3d4   :  { %1149 = dma.done.wait [#allocation3], 128  }
 0x3d5   :  { %1150 = vsyncadd [#allocation3], 4294967168 }
 0x3d6   :  { %855 = vsyncpa [#allocation3], 1 }

</bundles_post_ra>
